<compile_context>
chip_gen: v7x
topology: tpu7x:2x2x1
jax: 0.10.0
libtpu: 0.0.40
codegen_flags: <defaults>
</compile_context>

<pallas_src>
import functools

import jax
import jax.numpy as jnp
from jax.experimental import pallas as pl
from jax.experimental.pallas import tpu as pltpu

LN_EPS = 1e-5
_INV_SQRT2 = 0.7071067811865476  # 1/sqrt(2), compile-time constant


def _gelu_exact(x):
    # PyTorch nn.GELU() default: 0.5 * x * (1 + erf(x / sqrt(2)))
    return 0.5 * x * (1.0 + jax.lax.erf(x * _INV_SQRT2))


def projection_t2_kernel(x_ref, w1_ref, w2_ref, params_ref, o_ref, *,
                         approx_gelu):
    # x is f32 in HBM; cast to bf16 in VMEM (cheap VPU op hidden under matmul).
    x = x_ref[...].astype(jnp.bfloat16)     # (TM, E)  bf16
    w1 = w1_ref[...]                        # (E, P)   bf16 (prepared once)
    w2 = w2_ref[...]                        # (P, P)   bf16 (prepared once)
    params = params_ref[...]                # (4, P)   f32
    b1 = params[0:1, :]
    b2 = params[1:2, :]
    gamma = params[2:3, :]
    beta = params[3:4, :]

    # projection = x @ W1 + b1   (bf16 operands, f32 MXU accumulation)
    projected = jnp.dot(x, w1, preferred_element_type=jnp.float32) + b1
    # GELU: exact erf (PyTorch parity) or tanh approximation (EUP path).
    if approx_gelu:
        h = jax.nn.gelu(projected, approximate=True)
    else:
        h = _gelu_exact(projected)
    # fc = gelu(h) @ W2 + b2     (bf16 operands, f32 accumulation)
    h = jnp.dot(h.astype(jnp.bfloat16), w2,
                preferred_element_type=jnp.float32) + b2
    # Dropout is identity at inference (module eval mode).
    h = h + projected
    # LayerNorm over last dim (projection_dim), eps=1e-5, affine; all f32.
    mean = jnp.mean(h, axis=-1, keepdims=True)
    centered = h - mean
    var = jnp.mean(centered * centered, axis=-1, keepdims=True)
    inv = jax.lax.rsqrt(var + LN_EPS)
    o_ref[...] = ((centered * inv) * gamma + beta).astype(o_ref.dtype)


def _choose_tile_m(n):
    """Row-tile heuristic.

    * n <= 512: a single grid step (v5e/v6e have one TC; a multi-step
      'parallel' grid there is just a serial loop with ~0.35us/step overhead).
      Rounded up to 16 so bf16 rows pack 2/sublane.
    * large n: 256/512-row tiles for MXU M-dim utilization, keeping >= 4 grid
      steps so each v7x TensorCore gets >= 2 steps (DMA/compute overlap).
    """
    if n <= 512:
        return max(16, -(-n // 16) * 16)
    if n >= 4 * 512:
        return 512
    return 256


def prepare_projection_t2_params(w1, b1, w2, b2, gamma, beta):
    """One-time parameter preparation (cache the result across calls):
    bf16 copies of W1/W2 and one consolidated (4, P) f32 operand."""
    P = w1.shape[1]
    w1_bf = w1.astype(jnp.bfloat16)                      # [E, P] (in, out)
    w2_bf = w2.astype(jnp.bfloat16)                      # [P, P] (in, out)
    params = jnp.stack([b1, b2, gamma, beta]).astype(jnp.float32).reshape(4, P)
    return w1_bf, w2_bf, params


def projection_t2(x, w1_bf, w2_bf, params, *, tile_m=None,
                  out_dtype=jnp.float32, approx_gelu=False):
    """x: [N, E] f32; w1_bf: [E, P] bf16; w2_bf: [P, P] bf16; params: [4, P] f32.

    Set out_dtype=jnp.bfloat16 to halve output HBM writeback if downstream
    consumers tolerate it (default f32 for PyTorch parity).
    """
    N, E = x.shape
    P = w1_bf.shape[1]

    if tile_m is None:
        tile_m = _choose_tile_m(N)
    grid = (pl.cdiv(N, tile_m),)   # ragged last block handled by Pallas masking

    out_bytes = jnp.dtype(out_dtype).itemsize
    cost = pl.CostEstimate(
        flops=2 * N * (E * P + P * P),
        transcendentals=N * P,                 # erf/tanh in GELU
        bytes_accessed=(N * E * 4              # x (f32, read once)
                        + E * P * 2 + P * P * 2 + 4 * P * 4   # weights/params
                        + N * P * out_bytes))  # output writeback

    # VMEM budget: double-buffered x/out tiles + single-buffered weights +
    # f32 intermediates headroom. Clamp to v7x physical VMEM (64 MiB); v5e's
    # scoped default is only 16 MiB, so be explicit.
    footprint = (2 * tile_m * E * 4
                 + 2 * tile_m * P * out_bytes
                 + E * P * 2 + P * P * 2 + 4 * P * 4
                 + 4 * tile_m * P * 4)
    vmem_limit = int(min(64 << 20, max(32 << 20, 2 * footprint)))

    kernel = functools.partial(projection_t2_kernel, approx_gelu=approx_gelu)

    def make_call(single_buffer_weights):
        def const_spec(shape):
            # Grid-invariant operands: constant index_map; single-buffering
            # halves their VMEM footprint (double-buffering buys nothing).
            if single_buffer_weights:
                return pl.BlockSpec(shape, lambda i: (0,) * len(shape),
                                    pipeline_mode=pl.Buffered(1))
            return pl.BlockSpec(shape, lambda i: (0,) * len(shape))

        return pl.pallas_call(
            kernel,
            out_shape=jax.ShapeDtypeStruct((N, P), out_dtype),
            grid_spec=pltpu.PrefetchScalarGridSpec(
                num_scalar_prefetch=0,
                grid=grid,
                in_specs=[
                    pl.BlockSpec((tile_m, E), lambda i: (i, 0)),  # x rows (f32)
                    const_spec((E, P)),        # W1 (bf16, resident)
                    const_spec((P, P)),        # W2 (bf16, resident)
                    const_spec((4, P)),        # b1/b2/gamma/beta (f32)
                ],
                out_specs=pl.BlockSpec((tile_m, P), lambda i: (i, 0)),
            ),
            compiler_params=pltpu.CompilerParams(
                dimension_semantics=("parallel",),
                vmem_limit_bytes=vmem_limit),
            cost_estimate=cost,
        )

    try:
        return make_call(True)(x, w1_bf, w2_bf, params)
    except Exception:  # pragma: no cover - fallback for older pipeline_mode support
        return make_call(False)(x, w1_bf, w2_bf, params)


# ---------------------------------------------------------------------------
# References for correctness checking.
# ---------------------------------------------------------------------------
def reference_f32(x, w1, b1, w2, b2, gamma, beta):
    projected = x @ w1 + b1
    h = _gelu_exact(projected)
    h = h @ w2 + b2
    h = h + projected
    mean = jnp.mean(h, axis=-1, keepdims=True)
    var = jnp.var(h, axis=-1, keepdims=True)
    return (h - mean) / jnp.sqrt(var + LN_EPS) * gamma + beta


def reference_bf16_matmul(x, w1, b1, w2, b2, gamma, beta):
    # Same math as the kernel (bf16 matmul operands, f32 accum/elementwise).
    xb = x.astype(jnp.bfloat16)
    w1b = w1.astype(jnp.bfloat16)
    w2b = w2.astype(jnp.bfloat16)
    projected = jnp.dot(xb, w1b, preferred_element_type=jnp.float32) + b1
    h = _gelu_exact(projected)
    h = jnp.dot(h.astype(jnp.bfloat16), w2b,
                preferred_element_type=jnp.float32) + b2
    h = h + projected
    mean = jnp.mean(h, axis=-1, keepdims=True)
    var = jnp.var(h, axis=-1, keepdims=True)
    return (h - mean) / jnp.sqrt(var + LN_EPS) * gamma + beta


if __name__ == "__main__":
    # Small, module-consistent shapes: batch of 16 token embeddings,
    # embedding_dim=32, projection_dim=128.
    N, E, P = 16, 32, 128

    key = jax.random.PRNGKey(0)
    kx, kw1, kb1, kw2, kb2 = jax.random.split(key, 5)

    x = jax.random.normal(kx, (N, E), dtype=jnp.float32)

    # Deterministic param init (uniform like PyTorch Linear default, synthetic).
    lim1 = 1.0 / jnp.sqrt(E)
    w1 = jax.random.uniform(kw1, (E, P), jnp.float32, -lim1, lim1)   # [in, out]
    b1 = jax.random.uniform(kb1, (P,), jnp.float32, -lim1, lim1)
    lim2 = 1.0 / jnp.sqrt(P)
    w2 = jax.random.uniform(kw2, (P, P), jnp.float32, -lim2, lim2)   # [in, out]
    b2 = jax.random.uniform(kb2, (P,), jnp.float32, -lim2, lim2)
    gamma = jnp.ones((P,), jnp.float32)
    beta = jnp.zeros((P,), jnp.float32)

    # One-time parameter prep (bf16 weights + consolidated params), reused
    # across calls — no per-call convert traffic.
    w1_bf, w2_bf, params = prepare_projection_t2_params(
        w1, b1, w2, b2, gamma, beta)

    out = projection_t2(x, w1_bf, w2_bf, params)
    out = jax.block_until_ready(out)
    assert out.shape == (N, P)
    assert not bool(jnp.any(jnp.isnan(out)))

    # 1) Exact fusion check vs. a reference that uses the same bf16-operand /
    #    f32-accumulate matmuls as the kernel.
    ref_bf = reference_bf16_matmul(x, w1, b1, w2, b2, gamma, beta)
    err_bf = float(jnp.max(jnp.abs(out - ref_bf)))
    assert jnp.allclose(out, ref_bf, atol=1e-3, rtol=1e-3), err_bf

    # 2) End-to-end accuracy vs. the full-f32 PyTorch-equivalent reference
    #    (deviation comes only from bf16 rounding of the matmul operands).
    ref_f32 = reference_f32(x, w1, b1, w2, b2, gamma, beta)
    err_f32 = float(jnp.max(jnp.abs(out - ref_f32)))
    assert jnp.allclose(out, ref_f32, atol=2e-2, rtol=2e-2), err_f32

    # 3) Ragged-N check: N not divisible by tile_m, no wrapper pad / output
    #    slice — exercises Pallas's masked partial last block.
    N2 = 40
    x2 = jax.random.normal(jax.random.PRNGKey(1), (N2, E), dtype=jnp.float32)
    out2 = jax.block_until_ready(
        projection_t2(x2, w1_bf, w2_bf, params, tile_m=16))
    assert out2.shape == (N2, P)
    assert not bool(jnp.any(jnp.isnan(out2)))
    ref2 = reference_bf16_matmul(x2, w1, b1, w2, b2, gamma, beta)
    err2 = float(jnp.max(jnp.abs(out2 - ref2)))
    assert jnp.allclose(out2, ref2, atol=1e-3, rtol=1e-3), err2

    print("KERNEL_OK")
</pallas_src>

<mosaic_0001>
module attributes {stable_mosaic.version = 11 : i64} {
  func.func @projection_t2_kernel(%arg0: i32, %arg1: memref<16x32xf32, #tpu.memory_space<vmem>>, %arg2: memref<32x128xbf16, #tpu.memory_space<vmem>>, %arg3: memref<128x128xbf16, #tpu.memory_space<vmem>>, %arg4: memref<4x128xf32, #tpu.memory_space<vmem>>, %arg5: memref<16x128xf32, #tpu.memory_space<vmem>>) attributes {dimension_semantics = [#tpu.dimension_semantics<parallel>], iteration_bounds = array<i64: 1>, scalar_prefetch = 0 : i64, scratch_operands = 0 : i64, tpu.core_type = #tpu.core_type<tc>, window_params = [{transform_indices = @transform_0, window_bounds = array<i64: 16, 32>}, {pipeline_mode = #tpu.pipeline_mode<synchronous>, transform_indices = @transform_1, window_bounds = array<i64: 32, 128>}, {pipeline_mode = #tpu.pipeline_mode<synchronous>, transform_indices = @transform_2, window_bounds = array<i64: 128, 128>}, {pipeline_mode = #tpu.pipeline_mode<synchronous>, transform_indices = @transform_3, window_bounds = array<i64: 4, 128>}, {transform_indices = @transform_4, window_bounds = array<i64: 16, 128>}]} {
    %c0 = arith.constant 0 : index
    %c0_0 = arith.constant 0 : index
    %0 = vector.load %arg1[%c0, %c0_0] : memref<16x32xf32, #tpu.memory_space<vmem>>, vector<16x32xf32>
    %1 = arith.truncf %0 : vector<16x32xf32> to vector<16x32xbf16>
    %c0_1 = arith.constant 0 : index
    %c0_2 = arith.constant 0 : index
    %2 = vector.load %arg2[%c0_1, %c0_2] : memref<32x128xbf16, #tpu.memory_space<vmem>>, vector<32x128xbf16>
    %c0_3 = arith.constant 0 : index
    %c0_4 = arith.constant 0 : index
    %3 = vector.load %arg3[%c0_3, %c0_4] : memref<128x128xbf16, #tpu.memory_space<vmem>>, vector<128x128xbf16>
    %c0_5 = arith.constant 0 : index
    %c0_6 = arith.constant 0 : index
    %4 = vector.load %arg4[%c0_5, %c0_6] : memref<4x128xf32, #tpu.memory_space<vmem>>, vector<4x128xf32>
    %5 = vector.extract_strided_slice %4 {offsets = [0, 0], sizes = [1, 128], strides = [1, 1]} : vector<4x128xf32> to vector<1x128xf32>
    %6 = vector.extract_strided_slice %4 {offsets = [1, 0], sizes = [1, 128], strides = [1, 1]} : vector<4x128xf32> to vector<1x128xf32>
    %7 = vector.extract_strided_slice %4 {offsets = [2, 0], sizes = [1, 128], strides = [1, 1]} : vector<4x128xf32> to vector<1x128xf32>
    %8 = vector.extract_strided_slice %4 {offsets = [3, 0], sizes = [1, 128], strides = [1, 1]} : vector<4x128xf32> to vector<1x128xf32>
    %cst = arith.constant dense<0.000000e+00> : vector<16x128xf32>
    %9 = tpu.matmul %1, %2, %cst {dimension_numbers = #tpu.dot_dimension_numbers<[1], [0], [0], [1], [0, 0, 1, 1], [], []>} : vector<16x32xbf16>, vector<32x128xbf16>, vector<16x128xf32> -> vector<16x128xf32>
    %10 = vector.broadcast %5 : vector<1x128xf32> to vector<16x128xf32>
    %11 = arith.addf %9, %10 : vector<16x128xf32>
    %cst_7 = arith.constant 5.000000e-01 : f32
    %12 = vector.broadcast %cst_7 : f32 to vector<16x128xf32>
    %13 = arith.mulf %12, %11 : vector<16x128xf32>
    %cst_8 = arith.constant 0.707106769 : f32
    %14 = vector.broadcast %cst_8 : f32 to vector<16x128xf32>
    %15 = arith.mulf %11, %14 : vector<16x128xf32>
    %16 = math.erf %15 : vector<16x128xf32>
    %cst_9 = arith.constant 1.000000e+00 : f32
    %17 = vector.broadcast %cst_9 : f32 to vector<16x128xf32>
    %18 = arith.addf %17, %16 : vector<16x128xf32>
    %19 = arith.mulf %13, %18 : vector<16x128xf32>
    %20 = arith.truncf %19 : vector<16x128xf32> to vector<16x128xbf16>
    %cst_10 = arith.constant dense<0.000000e+00> : vector<16x128xf32>
    %21 = tpu.matmul %20, %3, %cst_10 {dimension_numbers = #tpu.dot_dimension_numbers<[1], [0], [0], [1], [0, 0, 1, 1], [], []>} : vector<16x128xbf16>, vector<128x128xbf16>, vector<16x128xf32> -> vector<16x128xf32>
    %22 = vector.broadcast %6 : vector<1x128xf32> to vector<16x128xf32>
    %23 = arith.addf %21, %22 : vector<16x128xf32>
    %24 = arith.addf %23, %11 : vector<16x128xf32>
    %cst_11 = arith.constant dense<0.000000e+00> : vector<16xf32>
    %25 = vector.multi_reduction <add>, %24, %cst_11 [1] : vector<16x128xf32> to vector<16xf32>
    %26 = vector.shape_cast %25 : vector<16xf32> to vector<16x1xf32>
    %cst_12 = arith.constant 1.280000e+02 : f32
    %27 = vector.broadcast %cst_12 : f32 to vector<16x1xf32>
    %28 = arith.divf %26, %27 : vector<16x1xf32>
    %29 = vector.broadcast %28 : vector<16x1xf32> to vector<16x128xf32>
    %30 = arith.subf %24, %29 : vector<16x128xf32>
    %31 = arith.mulf %30, %30 : vector<16x128xf32>
    %cst_13 = arith.constant dense<0.000000e+00> : vector<16xf32>
    %32 = vector.multi_reduction <add>, %31, %cst_13 [1] : vector<16x128xf32> to vector<16xf32>
    %33 = vector.shape_cast %32 : vector<16xf32> to vector<16x1xf32>
    %cst_14 = arith.constant 1.280000e+02 : f32
    %34 = vector.broadcast %cst_14 : f32 to vector<16x1xf32>
    %35 = arith.divf %33, %34 : vector<16x1xf32>
    %cst_15 = arith.constant 9.99999974E-6 : f32
    %36 = vector.broadcast %cst_15 : f32 to vector<16x1xf32>
    %37 = arith.addf %35, %36 : vector<16x1xf32>
    %38 = math.rsqrt %37 : vector<16x1xf32>
    %39 = vector.broadcast %38 : vector<16x1xf32> to vector<16x128xf32>
    %40 = arith.mulf %30, %39 : vector<16x128xf32>
    %41 = vector.broadcast %7 : vector<1x128xf32> to vector<16x128xf32>
    %42 = arith.mulf %40, %41 : vector<16x128xf32>
    %43 = vector.broadcast %8 : vector<1x128xf32> to vector<16x128xf32>
    %44 = arith.addf %42, %43 : vector<16x128xf32>
    %c0_16 = arith.constant 0 : index
    %c0_17 = arith.constant 0 : index
    %45 = vector.load %arg5[%c0_16, %c0_17] : memref<16x128xf32, #tpu.memory_space<vmem>>, vector<16x128xf32>
    tpu.vector_store %arg5[%c0_16, %c0_17], %44 {strides = array<i32>} : memref<16x128xf32, #tpu.memory_space<vmem>>, vector<16x128xf32>,
    return
  }
  func.func @transform_0(%arg0: i32) -> (i32, i32) {
    %c0_i32 = arith.constant 0 : i32
    %c0_i32_0 = arith.constant 0 : i32
    return %arg0, %c0_i32 : i32, i32
  }
  func.func @transform_1(%arg0: i32) -> (i32, i32) {
    %c0_i32 = arith.constant 0 : i32
    %c0_i32_0 = arith.constant 0 : i32
    %c0_i32_1 = arith.constant 0 : i32
    return %c0_i32, %c0_i32_0 : i32, i32
  }
  func.func @transform_2(%arg0: i32) -> (i32, i32) {
    %c0_i32 = arith.constant 0 : i32
    %c0_i32_0 = arith.constant 0 : i32
    %c0_i32_1 = arith.constant 0 : i32
    return %c0_i32, %c0_i32_0 : i32, i32
  }
  func.func @transform_3(%arg0: i32) -> (i32, i32) {
    %c0_i32 = arith.constant 0 : i32
    %c0_i32_0 = arith.constant 0 : i32
    %c0_i32_1 = arith.constant 0 : i32
    return %c0_i32, %c0_i32_0 : i32, i32
  }
  func.func @transform_4(%arg0: i32) -> (i32, i32) {
    %c0_i32 = arith.constant 0 : i32
    %c0_i32_0 = arith.constant 0 : i32
    return %arg0, %c0_i32 : i32, i32
  }
}

module attributes {stable_mosaic.version = 11 : i64} {
  func.func @projection_t2_kernel(%arg0: i32, %arg1: memref<16x32xf32, #tpu.memory_space<vmem>>, %arg2: memref<32x128xbf16, #tpu.memory_space<vmem>>, %arg3: memref<128x128xbf16, #tpu.memory_space<vmem>>, %arg4: memref<4x128xf32, #tpu.memory_space<vmem>>, %arg5: memref<16x128xf32, #tpu.memory_space<vmem>>) attributes {dimension_semantics = [#tpu.dimension_semantics<parallel>], iteration_bounds = array<i64: 1>, scalar_prefetch = 0 : i64, scratch_operands = 0 : i64, tpu.core_type = #tpu.core_type<tc>, window_params = [{transform_indices = @transform_0, window_bounds = array<i64: 16, 32>}, {pipeline_mode = #tpu.pipeline_mode<synchronous>, transform_indices = @transform_1, window_bounds = array<i64: 32, 128>}, {pipeline_mode = #tpu.pipeline_mode<synchronous>, transform_indices = @transform_2, window_bounds = array<i64: 128, 128>}, {pipeline_mode = #tpu.pipeline_mode<synchronous>, transform_indices = @transform_3, window_bounds = array<i64: 4, 128>}, {transform_indices = @transform_4, window_bounds = array<i64: 16, 128>}]} {
    %c0 = arith.constant 0 : index
    %c0_0 = arith.constant 0 : index
    %0 = vector.load %arg1[%c0, %c0_0] : memref<16x32xf32, #tpu.memory_space<vmem>>, vector<16x32xf32>
    %1 = arith.truncf %0 : vector<16x32xf32> to vector<16x32xbf16>
    %c0_1 = arith.constant 0 : index
    %c0_2 = arith.constant 0 : index
    %2 = vector.load %arg2[%c0_1, %c0_2] : memref<32x128xbf16, #tpu.memory_space<vmem>>, vector<32x128xbf16>
    %c0_3 = arith.constant 0 : index
    %c0_4 = arith.constant 0 : index
    %3 = vector.load %arg3[%c0_3, %c0_4] : memref<128x128xbf16, #tpu.memory_space<vmem>>, vector<128x128xbf16>
    %c0_5 = arith.constant 0 : index
    %c0_6 = arith.constant 0 : index
    %4 = vector.load %arg4[%c0_5, %c0_6] : memref<4x128xf32, #tpu.memory_space<vmem>>, vector<4x128xf32>
    %5 = vector.extract_strided_slice %4 {offsets = [0, 0], sizes = [1, 128], strides = [1, 1]} : vector<4x128xf32> to vector<1x128xf32>
    %6 = vector.extract_strided_slice %4 {offsets = [1, 0], sizes = [1, 128], strides = [1, 1]} : vector<4x128xf32> to vector<1x128xf32>
    %7 = vector.extract_strided_slice %4 {offsets = [2, 0], sizes = [1, 128], strides = [1, 1]} : vector<4x128xf32> to vector<1x128xf32>
    %8 = vector.extract_strided_slice %4 {offsets = [3, 0], sizes = [1, 128], strides = [1, 1]} : vector<4x128xf32> to vector<1x128xf32>
    %cst = arith.constant dense<0.000000e+00> : vector<16x128xf32>
    %9 = tpu.matmul %1, %2, %cst {dimension_numbers = #tpu.dot_dimension_numbers<[1], [0], [0], [1], [0, 0, 1, 1], [], []>} : vector<16x32xbf16>, vector<32x128xbf16>, vector<16x128xf32> -> vector<16x128xf32>
    %10 = vector.broadcast %5 : vector<1x128xf32> to vector<16x128xf32>
    %11 = arith.addf %9, %10 : vector<16x128xf32>
    %cst_7 = arith.constant 5.000000e-01 : f32
    %12 = vector.broadcast %cst_7 : f32 to vector<16x128xf32>
    %13 = arith.mulf %12, %11 : vector<16x128xf32>
    %cst_8 = arith.constant 0.707106769 : f32
    %14 = vector.broadcast %cst_8 : f32 to vector<16x128xf32>
    %15 = arith.mulf %11, %14 : vector<16x128xf32>
    %16 = math.erf %15 : vector<16x128xf32>
    %cst_9 = arith.constant 1.000000e+00 : f32
    %17 = vector.broadcast %cst_9 : f32 to vector<16x128xf32>
    %18 = arith.addf %17, %16 : vector<16x128xf32>
    %19 = arith.mulf %13, %18 : vector<16x128xf32>
    %20 = arith.truncf %19 : vector<16x128xf32> to vector<16x128xbf16>
    %cst_10 = arith.constant dense<0.000000e+00> : vector<16x128xf32>
    %21 = tpu.matmul %20, %3, %cst_10 {dimension_numbers = #tpu.dot_dimension_numbers<[1], [0], [0], [1], [0, 0, 1, 1], [], []>} : vector<16x128xbf16>, vector<128x128xbf16>, vector<16x128xf32> -> vector<16x128xf32>
    %22 = vector.broadcast %6 : vector<1x128xf32> to vector<16x128xf32>
    %23 = arith.addf %21, %22 : vector<16x128xf32>
    %24 = arith.addf %23, %11 : vector<16x128xf32>
    %cst_11 = arith.constant dense<0.000000e+00> : vector<16xf32>
    %25 = vector.multi_reduction <add>, %24, %cst_11 [1] : vector<16x128xf32> to vector<16xf32>
    %26 = vector.shape_cast %25 : vector<16xf32> to vector<16x1xf32>
    %cst_12 = arith.constant 1.280000e+02 : f32
    %27 = vector.broadcast %cst_12 : f32 to vector<16x1xf32>
    %28 = arith.divf %26, %27 : vector<16x1xf32>
    %29 = vector.broadcast %28 : vector<16x1xf32> to vector<16x128xf32>
    %30 = arith.subf %24, %29 : vector<16x128xf32>
    %31 = arith.mulf %30, %30 : vector<16x128xf32>
    %cst_13 = arith.constant dense<0.000000e+00> : vector<16xf32>
    %32 = vector.multi_reduction <add>, %31, %cst_13 [1] : vector<16x128xf32> to vector<16xf32>
    %33 = vector.shape_cast %32 : vector<16xf32> to vector<16x1xf32>
    %cst_14 = arith.constant 1.280000e+02 : f32
    %34 = vector.broadcast %cst_14 : f32 to vector<16x1xf32>
    %35 = arith.divf %33, %34 : vector<16x1xf32>
    %cst_15 = arith.constant 9.99999974E-6 : f32
    %36 = vector.broadcast %cst_15 : f32 to vector<16x1xf32>
    %37 = arith.addf %35, %36 : vector<16x1xf32>
    %38 = math.rsqrt %37 : vector<16x1xf32>
    %39 = vector.broadcast %38 : vector<16x1xf32> to vector<16x128xf32>
    %40 = arith.mulf %30, %39 : vector<16x128xf32>
    %41 = vector.broadcast %7 : vector<1x128xf32> to vector<16x128xf32>
    %42 = arith.mulf %40, %41 : vector<16x128xf32>
    %43 = vector.broadcast %8 : vector<1x128xf32> to vector<16x128xf32>
    %44 = arith.addf %42, %43 : vector<16x128xf32>
    %c0_16 = arith.constant 0 : index
    %c0_17 = arith.constant 0 : index
    %45 = vector.load %arg5[%c0_16, %c0_17] : memref<16x128xf32, #tpu.memory_space<vmem>>, vector<16x128xf32>
    tpu.vector_store %arg5[%c0_16, %c0_17], %44 {strides = array<i32>} : memref<16x128xf32, #tpu.memory_space<vmem>>, vector<16x128xf32>,
    return
  }
  func.func @transform_0(%arg0: i32) -> (i32, i32) {
    %c0_i32 = arith.constant 0 : i32
    %c0_i32_0 = arith.constant 0 : i32
    return %arg0, %c0_i32 : i32, i32
  }
  func.func @transform_1(%arg0: i32) -> (i32, i32) {
    %c0_i32 = arith.constant 0 : i32
    %c0_i32_0 = arith.constant 0 : i32
    %c0_i32_1 = arith.constant 0 : i32
    return %c0_i32, %c0_i32_0 : i32, i32
  }
  func.func @transform_2(%arg0: i32) -> (i32, i32) {
    %c0_i32 = arith.constant 0 : i32
    %c0_i32_0 = arith.constant 0 : i32
    %c0_i32_1 = arith.constant 0 : i32
    return %c0_i32, %c0_i32_0 : i32, i32
  }
  func.func @transform_3(%arg0: i32) -> (i32, i32) {
    %c0_i32 = arith.constant 0 : i32
    %c0_i32_0 = arith.constant 0 : i32
    %c0_i32_1 = arith.constant 0 : i32
    return %c0_i32, %c0_i32_0 : i32, i32
  }
  func.func @transform_4(%arg0: i32) -> (i32, i32) {
    %c0_i32 = arith.constant 0 : i32
    %c0_i32_0 = arith.constant 0 : i32
    return %arg0, %c0_i32 : i32, i32
  }
}

</mosaic_0001>

<bundles_post_ra>
// kernel: tpu_custom_call.1
= control target key start
LH: loop header
LB: loop body
LE: loop exit
PB: predicated region body
PF: predicated region fallthrough
CT: control target
= control target key end

     0   :  { %9 = vsyncpa [#allocation3], 0  ;;  %s577_s0 = inlined_call_operand.hbm [shape: f32[16,32], index: 0, kind: input, shape index: {}]   ;;  %s578_s1 = inlined_call_operand.hbm [shape: bf16[32,128], index: 1, kind: input, shape index: {}]   ;;  %s579_s2 = inlined_call_operand.hbm [shape: bf16[128,128], index: 2, kind: input, shape index: {}]   ;;  %s580_s3 = inlined_call_operand.vmem [shape: f32[4,128], index: 3, kind: input, shape index: {}]   ;;  %s581_s4 = inlined_call_operand.hbm [shape: f32[16,128], index: 4, kind: output, shape index: {}]  }
   0x1   :  { %10 = vsyncpa [#allocation6], 0 }
   0x2   :  { %11 = vsyncpa [#allocation4], 0  ;;  %s479_s15 = smov [#allocation5]   ;;  %s385_s19 = scalar_lea.hbm %s578_s1, 256 }
   0x3   :  { %s29_s16 = sshll.u32 %s479_s15, 4  ;;  %p386_p0 = scmp.ne.s32.totalorder %s578_s1, %s385_s19  ;;  %s30_s16 = int_to_ptr.vmem [resolvable:$true] %s29_s16 }
   0x4   :  { %p389_p1 = scmp.lt.u32.totalorder %s385_s19, %s578_s1 }
   0x6   :  { %p391_p2 = pnand %p389_p1, %p386_p0 }
   0x8   :  { %394 = shalt.err (!%p391_p2)
}
   0x9   :  { %s395_s24 = scalar_lea.vmem %s30_s16, 256  ;;  %p400_p4 = scmp.lt.s32.totalorder %s30_s16, %s30_s16 }
   0xa   :  { %p396_p3 = scmp.ne.s32.totalorder %s30_s16, %s395_s24  ;;  %p401_p5 = scmp.lt.s32.totalorder %s395_s24, %s395_s24 }
   0xc   :  { %p402_p6 = por %p401_p5, %p400_p4 }
   0xe   :  { %p403_p7 = pnand %p402_p6, %p396_p3 }
  0x10   :  { %406 = shalt.err (!%p403_p7)
}
  0x11   :  { %s480_s25 = smov 64   ;;  %s481_s26 = smov 4  }
  0x12   :  { %35 = dma.hbm_to_vmem [thread:$0]  %s578_s1, 256, %s30_s16, [#allocation6], %s480_s25, %s480_s25, %s481_s26  }
  0x13   :  { %s482_s29 = smov [#allocation2]   ;;  %s407_s7 = scalar_lea.hbm %s577_s0, 256 }
  0x14   :  { %s17_s30 = sshll.u32 %s482_s29, 4  ;;  %p408_p8 = scmp.ne.s32.totalorder %s577_s0, %s407_s7  ;;  %s18_s30 = int_to_ptr.vmem [resolvable:$true] %s17_s30 }
  0x15   :  { %p411_p9 = scmp.lt.u32.totalorder %s407_s7, %s577_s0 }
  0x17   :  { %p413_p10 = pnand %p411_p9, %p408_p8 }
  0x19   :  { %416 = shalt.err (!%p413_p10)
}
  0x1a   :  { %s417_s12 = scalar_lea.vmem %s18_s30, 256  ;;  %p422_p12 = scmp.lt.s32.totalorder %s18_s30, %s18_s30 }
  0x1b   :  { %p418_p11 = scmp.ne.s32.totalorder %s18_s30, %s417_s12  ;;  %p423_p13 = scmp.lt.s32.totalorder %s417_s12, %s417_s12 }
  0x1d   :  { %p424_p0 = por %p423_p13, %p422_p12 }
  0x1f   :  { %p425_p1 = pnand %p424_p0, %p418_p11 }
  0x21   :  { %428 = shalt.err (!%p425_p1)
}
  0x22   :  { %s483_s1 = smov 128   ;;  %s484_s13 = smov 8  }
  0x23   :  { %23 = dma.hbm_to_vmem [thread:$0]  %s577_s0, 256, %s18_s30, [#allocation3], %s483_s1, %s483_s1, %s484_s13  }
  0x24   :  { %s485_s16 = smov [#allocation7]   ;;  %s429_s20 = scalar_lea.hbm %s579_s2, 1024 }
  0x25   :  { %s41_s17 = sshll.u32 %s485_s16, 4  ;;  %p430_p2 = scmp.ne.s32.totalorder %s579_s2, %s429_s20  ;;  %s42_s17 = int_to_ptr.vmem [resolvable:$true] %s41_s17 }
  0x26   :  { %p433_p3 = scmp.lt.u32.totalorder %s429_s20, %s579_s2 }
  0x28   :  { %p435_p4 = pnand %p433_p3, %p430_p2 }
  0x2a   :  { %438 = shalt.err (!%p435_p4)
}
  0x2b   :  { %s439_s27 = scalar_lea.vmem %s42_s17, 1024  ;;  %p444_p6 = scmp.lt.s32.totalorder %s42_s17, %s42_s17 }
  0x2c   :  { %p440_p5 = scmp.ne.s32.totalorder %s42_s17, %s439_s27  ;;  %p445_p7 = scmp.lt.s32.totalorder %s439_s27, %s439_s27 }
  0x2e   :  { %p446_p8 = por %p445_p7, %p444_p6 }
  0x30   :  { %p447_p9 = pnand %p446_p8, %p440_p5 }
  0x32   :  { %450 = shalt.err (!%p447_p9)
}
  0x33   :  { %47 = dma.hbm_to_vmem [thread:$0]  %s579_s2, 1024, %s42_s17, [#allocation6], %s480_s25, %s480_s25, %s481_s26  }
  0x34   :  { %473 = dma.done.wait [#allocation3], 256  }
  0x35   :  { %474 = vsyncadd [#allocation3], 4294967040 }
  0x36   :  { %475 = dma.done.wait [#allocation6], 1280  }
  0x37   :  { %476 = vsyncadd [#allocation6], 4294966016  ;;  %v486_v0 = vmov 0.0   ;;  %vm487_vm0 = vmmov 0   ;;  %v367_v1 = vld [vmem:[#allocation5] sm:$0xff]   ;;  %v368_v2 = vld [vmem:[#allocation5 + $0x8] sm:$0xff]   ;;  %v84_v14 = vlaneseq }
  0x38   :  { %329 = vmatprep.subr.bf16.mxu0 %v486_v0  ;;  %333 = vmatprep.mubr.msk.bf16.mxu0 %vm487_vm0, %v486_v0  ;;  %v60_v3 = vld [vmem:[#allocation2] sm:$0xff]  ;;  %v61_v4 = vld [vmem:[#allocation2 + $0x8] sm:$0xff]  ;;  %vm100_vm1 = vcmask 261120   ;;  %v371_v8 = vld [vmem:[#allocation7 + $0x10] sm:$0xff]  }
  0x39   :  { %337 = vmatprep.subr.bf16.mxu1 %v486_v0  ;;  %353 = vmatprep.mubr.msk.bf16.mxu1 %vm487_vm0, %v486_v0  ;;  %v369_v5 = vld [vmem:[#allocation7] sm:$0xff]   ;;  %v370_v6 = vld [vmem:[#allocation7 + $0x8] sm:$0xff]   ;;  %v62_v7 = vpack.c.bf16 %v61_v4, %v60_v3  ;;  %v372_v9 = vld [vmem:[#allocation7 + $0x18] sm:$0xff]   ;;  %v85_v15 = vshrl.u32 %v84_v14, 7 }
  0x3a   :  { %330 = vmatpush3.bf16.msra.mxu0 %v367_v1  ;;  %338 = vmatpush3.bf16.msra.mxu1 %v369_v5  ;;  %v373_v10 = vld [vmem:[#allocation7 + $0x20] sm:$0xff]   ;;  %v374_v11 = vld [vmem:[#allocation7 + $0x28] sm:$0xff]   ;;  %v375_v12 = vld [vmem:[#allocation7 + $0x30] sm:$0xff]  }
  0x3b   :  { %331 = vmatprep.subr.bf16.mxu0 %v486_v0  ;;  %339 = vmatprep.subr.bf16.mxu1 %v486_v0  ;;  %v376_v13 = vld [vmem:[#allocation7 + $0x38] sm:$0xff]   ;;  %v86_v16 = vsub.s32 0, %v85_v15  ;;  %v83_v17 = vld [vmem:[%s580_s3] sm:$0xf]  ;;  %v158_v36 = vsub.s32 1, %v85_v15  ;;  %v276_v60 = vsub.s32 2, %v85_v15 }
  0x3c   :  { %v282_v61 = vsub.s32 3, %v85_v15  ;;  %s488_s3 = smov [#allocation8]  }
  0x3d   :  { %v87_v18 = vrot.slane %v83_v17, %v86_v16  ;;  %v159_v37 = vrot.slane %v83_v17, %v158_v36  ;;  %v277_v62 = vrot.slane %v83_v17, %v276_v60  ;;  %s293_s26 = sshll.u32 %s488_s3, 4  ;;  %s294_s26 = int_to_ptr.vmem [resolvable:$true] %s293_s26 }
  0x3e   :  { %332 = vmatpush3.bf16.msra.mxu0 %v368_v2  ;;  %340 = vmatpush3.bf16.msra.mxu1 %v370_v6  ;;  %v283_v1 = vrot.slane %v83_v17, %v282_v61  ;;  %s451_s29 = scalar_lea.vmem %s294_s26, 256  ;;  %p456_p11 = scmp.lt.s32.totalorder %s294_s26, %s294_s26 }
  0x3f   :  { %341 = vmatprep.subr.bf16.mxu1 %v486_v0  ;;  %p452_p10 = scmp.ne.s32.totalorder %s294_s26, %s451_s29  ;;  %p457_p12 = scmp.lt.s32.totalorder %s451_s29, %s451_s29 }
  0x41   :  { %334 = vmatmul.mubr.msk.bf16.vlgmr.msra.gmra.mrb[0].mxu0 %vm100_vm1, %v62_v7  ;;  %p458_p13 = por %p457_p12, %p456_p11 }
  0x42   :  { %342 = vmatpush3.bf16.msra.mxu1 %v371_v8 }
  0x43   :  { %343 = vmatprep.subr.bf16.mxu1 %v486_v0  ;;  %p459_p0 = pnand %p458_p13, %p452_p10 }
  0x46   :  { %344 = vmatpush3.bf16.msra.mxu1 %v372_v9 }
  0x47   :  { %345 = vmatprep.subr.bf16.mxu1 %v486_v0 }
  0x4a   :  { %346 = vmatpush3.bf16.msra.mxu1 %v373_v10 }
  0x4b   :  { %347 = vmatprep.subr.bf16.mxu1 %v486_v0 }
  0x4e   :  { %348 = vmatpush3.bf16.msra.mxu1 %v374_v11 }
  0x4f   :  { %349 = vmatprep.subr.bf16.mxu1 %v486_v0 }
  0x52   :  { %350 = vmatpush3.bf16.msra.mxu1 %v375_v12 }
  0x53   :  { %351 = vmatprep.subr.bf16.mxu1 %v486_v0 }
  0x56   :  { %352 = vmatpush3.bf16.msra.mxu1 %v376_v13 }
 0x114   :  { %v138_v19 = vpop.f32.mrb[0].mxu0 }
 0x115   :  { %v139_v20 = vadd.f32 %v138_v19, %v87_v18  ;;  %v335_v21 = vpop.f32.mrb[1].mxu0 }
 0x116   :  { %v141_v22 = vpop.f32.mrb[2].mxu0 }
 0x117   :  { %v147_v23 = vmul.f32 0.70710677, %v139_v20  ;;  %v142_v24 = vadd.f32 %v141_v22, %v87_v18  ;;  %v336_v25 = vpop.f32.mrb[3].mxu0  ;;  %v145_v30 = vmul.f32 0.5, %v139_v20 }
 0x119   :  { %377 = verf.f32 %v147_v23  ;;  %v148_v26 = vmul.f32 0.70710677, %v142_v24  ;;  %v146_v31 = vmul.f32 0.5, %v142_v24 }
 0x11b   :  { %379 = verf.f32 %v148_v26 }
 0x123   :  { %v378_v27 = vpop.eup %377 }
 0x124   :  { %v151_v28 = vadd.f32 1.0, %v378_v27 }
 0x125   :  { %v380_v29 = vpop.eup %379 }
 0x126   :  { %v152_v32 = vadd.f32 1.0, %v380_v29  ;;  %v153_v33 = vmul.f32 %v151_v28, %v145_v30 }
 0x128   :  { %v154_v34 = vmul.f32 %v152_v32, %v146_v31 }
 0x12a   :  { %v155_v35 = vpack.c.bf16 %v154_v34, %v153_v33 }
 0x12c   :  { %354 = vmatmul.mubr.bf16.vlgmr.msra.gmra.mrb[0].mxu1 %v155_v35 }
 0x1ff   :  { %v242_v38 = vpop.f32.mrb[0].mxu1 }
 0x200   :  { %v243_v39 = vadd.f32 %v242_v38, %v159_v37  ;;  %v355_v40 = vpop.f32.mrb[1].mxu1 }
 0x201   :  { %v245_v41 = vpop.f32.mrb[2].mxu1 }
 0x202   :  { %v246_v42 = vadd.f32 %v245_v41, %v159_v37  ;;  %v356_v43 = vpop.f32.mrb[3].mxu1  ;;  %v249_v44 = vadd.f32 %v243_v39, %v139_v20 }
 0x204   :  { %251 = vadd.xlane.f32.xlu0 %v249_v44  ;;  %v250_v45 = vadd.f32 %v246_v42, %v142_v24 }
 0x208   :  { %253 = vadd.xlane.f32.xlu0 %v250_v45 }
 0x291   :  { %v252_v46 = vpop.xlane.xlu0 %251 }
 0x292   :  { %v256_v47 = vmul.f32 0.0078125, %v252_v46 }
 0x294   :  { %v258_v48 = vsub.f32 %v249_v44, %v256_v47 }
 0x295   :  { %v254_v49 = vpop.xlane.xlu0 %253 }
 0x296   :  { %v257_v50 = vmul.f32 0.0078125, %v254_v49  ;;  %v260_v51 = vmul.f32 %v258_v48, %v258_v48 }
 0x298   :  { %v259_v52 = vsub.f32 %v250_v45, %v257_v50  ;;  %262 = vadd.xlane.f32.xlu1 %v260_v51 }
 0x29a   :  { %v261_v53 = vmul.f32 %v259_v52, %v259_v52 }
 0x29c   :  { %264 = vadd.xlane.f32.xlu1 %v261_v53 }
 0x325   :  { %v263_v54 = vpop.xlane.xlu1 %262 }
 0x326   :  { %v266_v55 = vmul.f32 0.0078125, %v263_v54 }
 0x328   :  { %v268_v56 = vadd.f32 1e-05, %v266_v55 }
 0x329   :  { %v265_v57 = vpop.xlane.xlu1 %264 }
 0x32a   :  { %381 = vrsqrt.f32 %v268_v56  ;;  %v267_v58 = vmul.f32 0.0078125, %v265_v57 }
 0x32c   :  { %v269_v59 = vadd.f32 1e-05, %v267_v58 }
 0x32e   :  { %383 = vrsqrt.f32 %v269_v59 }
 0x334   :  { %v382_v63 = vpop.eup %381 }
 0x335   :  { %v272_v0 = vmul.f32 %v382_v63, %v258_v48 }
 0x337   :  { %v278_v2 = vmul.f32 %v277_v62, %v272_v0 }
 0x338   :  { %v384_v3 = vpop.eup %383 }
 0x339   :  { %v273_v4 = vmul.f32 %v384_v3, %v259_v52  ;;  %v284_v5 = vadd.f32 %v283_v1, %v278_v2 }
 0x33b   :  { %v279_v6 = vmul.f32 %v277_v62, %v273_v4  ;;  %286 = vst [vmem:[#allocation8] sm:$0xff] %v284_v5 }
 0x33d   :  { %v285_v7 = vadd.f32 %v283_v1, %v279_v6 }
 0x33f   :  { %287 = vst [vmem:[#allocation8 + $0x8] sm:$0xff] %v285_v7 }
 0x340   :  { %462 = shalt.err (!%p459_p0)
}
 0x341   :  { %s463_s6 = scalar_lea.hbm %s581_s4, 256 }
 0x342   :  { %p464_p1 = scmp.ne.s32.totalorder %s581_s4, %s463_s6  ;;  %p467_p2 = scmp.lt.u32.totalorder %s463_s6, %s581_s4 }
 0x344   :  { %p469_p3 = pnand %p467_p2, %p464_p1 }
 0x346   :  { %472 = shalt.err (!%p469_p3)
}
 0x347   :  { %299 = dma.vmem_to_hbm [thread:$0]  %s294_s26, 256, %s581_s4, [#allocation4], %s483_s1, %s483_s1, %s484_s13  }
 0x348   :  { %477 = dma.done.wait [#allocation4], 256  }
 0x349   :  { %478 = vsyncadd [#allocation4], 4294967040 }
 0x34a   :  { %303 = vsyncpa [#allocation3], 1 }
 0x34b   :  { %304 = vsyncpa [#allocation6], 1 }
 0x34c   :  { %305 = vsyncpa [#allocation4], 1 }

// kernel: tpu_custom_call.1
= control target key start
LH: loop header
LB: loop body
LE: loop exit
PB: predicated region body
PF: predicated region fallthrough
CT: control target
= control target key end

     0   :  { %9 = vsyncpa [#allocation3], 0  ;;  %s577_s0 = inlined_call_operand.hbm [shape: f32[16,32], index: 0, kind: input, shape index: {}]   ;;  %s578_s1 = inlined_call_operand.hbm [shape: bf16[32,128], index: 1, kind: input, shape index: {}]   ;;  %s579_s2 = inlined_call_operand.hbm [shape: bf16[128,128], index: 2, kind: input, shape index: {}]   ;;  %s580_s3 = inlined_call_operand.vmem [shape: f32[4,128], index: 3, kind: input, shape index: {}]   ;;  %s581_s4 = inlined_call_operand.hbm [shape: f32[16,128], index: 4, kind: output, shape index: {}]  }
   0x1   :  { %10 = vsyncpa [#allocation6], 0 }
   0x2   :  { %11 = vsyncpa [#allocation4], 0  ;;  %s479_s15 = smov [#allocation5]   ;;  %s385_s19 = scalar_lea.hbm %s578_s1, 256 }
   0x3   :  { %s29_s16 = sshll.u32 %s479_s15, 4  ;;  %p386_p0 = scmp.ne.s32.totalorder %s578_s1, %s385_s19  ;;  %s30_s16 = int_to_ptr.vmem [resolvable:$true] %s29_s16 }
   0x4   :  { %p389_p1 = scmp.lt.u32.totalorder %s385_s19, %s578_s1 }
   0x6   :  { %p391_p2 = pnand %p389_p1, %p386_p0 }
   0x8   :  { %394 = shalt.err (!%p391_p2)
}
   0x9   :  { %s395_s24 = scalar_lea.vmem %s30_s16, 256  ;;  %p400_p4 = scmp.lt.s32.totalorder %s30_s16, %s30_s16 }
   0xa   :  { %p396_p3 = scmp.ne.s32.totalorder %s30_s16, %s395_s24  ;;  %p401_p5 = scmp.lt.s32.totalorder %s395_s24, %s395_s24 }
   0xc   :  { %p402_p6 = por %p401_p5, %p400_p4 }
   0xe   :  { %p403_p7 = pnand %p402_p6, %p396_p3 }
  0x10   :  { %406 = shalt.err (!%p403_p7)
}
  0x11   :  { %s480_s25 = smov 64   ;;  %s481_s26 = smov 4  }
  0x12   :  { %35 = dma.hbm_to_vmem [thread:$0]  %s578_s1, 256, %s30_s16, [#allocation6], %s480_s25, %s480_s25, %s481_s26  }
  0x13   :  { %s482_s29 = smov [#allocation2]   ;;  %s407_s7 = scalar_lea.hbm %s577_s0, 256 }
  0x14   :  { %s17_s30 = sshll.u32 %s482_s29, 4  ;;  %p408_p8 = scmp.ne.s32.totalorder %s577_s0, %s407_s7  ;;  %s18_s30 = int_to_ptr.vmem [resolvable:$true] %s17_s30 }
  0x15   :  { %p411_p9 = scmp.lt.u32.totalorder %s407_s7, %s577_s0 }
  0x17   :  { %p413_p10 = pnand %p411_p9, %p408_p8 }
  0x19   :  { %416 = shalt.err (!%p413_p10)
}
  0x1a   :  { %s417_s12 = scalar_lea.vmem %s18_s30, 256  ;;  %p422_p12 = scmp.lt.s32.totalorder %s18_s30, %s18_s30 }
  0x1b   :  { %p418_p11 = scmp.ne.s32.totalorder %s18_s30, %s417_s12  ;;  %p423_p13 = scmp.lt.s32.totalorder %s417_s12, %s417_s12 }
  0x1d   :  { %p424_p0 = por %p423_p13, %p422_p12 }
  0x1f   :  { %p425_p1 = pnand %p424_p0, %p418_p11 }
  0x21   :  { %428 = shalt.err (!%p425_p1)
}
  0x22   :  { %s483_s1 = smov 128   ;;  %s484_s13 = smov 8  }
  0x23   :  { %23 = dma.hbm_to_vmem [thread:$0]  %s577_s0, 256, %s18_s30, [#allocation3], %s483_s1, %s483_s1, %s484_s13  }
  0x24   :  { %s485_s16 = smov [#allocation7]   ;;  %s429_s20 = scalar_lea.hbm %s579_s2, 1024 }
  0x25   :  { %s41_s17 = sshll.u32 %s485_s16, 4  ;;  %p430_p2 = scmp.ne.s32.totalorder %s579_s2, %s429_s20  ;;  %s42_s17 = int_to_ptr.vmem [resolvable:$true] %s41_s17 }
  0x26   :  { %p433_p3 = scmp.lt.u32.totalorder %s429_s20, %s579_s2 }
  0x28   :  { %p435_p4 = pnand %p433_p3, %p430_p2 }
  0x2a   :  { %438 = shalt.err (!%p435_p4)
}
  0x2b   :  { %s439_s27 = scalar_lea.vmem %s42_s17, 1024  ;;  %p444_p6 = scmp.lt.s32.totalorder %s42_s17, %s42_s17 }
  0x2c   :  { %p440_p5 = scmp.ne.s32.totalorder %s42_s17, %s439_s27  ;;  %p445_p7 = scmp.lt.s32.totalorder %s439_s27, %s439_s27 }
  0x2e   :  { %p446_p8 = por %p445_p7, %p444_p6 }
  0x30   :  { %p447_p9 = pnand %p446_p8, %p440_p5 }
  0x32   :  { %450 = shalt.err (!%p447_p9)
}
  0x33   :  { %47 = dma.hbm_to_vmem [thread:$0]  %s579_s2, 1024, %s42_s17, [#allocation6], %s480_s25, %s480_s25, %s481_s26  }
  0x34   :  { %473 = dma.done.wait [#allocation3], 256  }
  0x35   :  { %474 = vsyncadd [#allocation3], 4294967040 }
  0x36   :  { %475 = dma.done.wait [#allocation6], 1280  }
  0x37   :  { %476 = vsyncadd [#allocation6], 4294966016  ;;  %v486_v0 = vmov 0.0   ;;  %vm487_vm0 = vmmov 0   ;;  %v367_v1 = vld [vmem:[#allocation5] sm:$0xff]   ;;  %v368_v2 = vld [vmem:[#allocation5 + $0x8] sm:$0xff]   ;;  %v84_v14 = vlaneseq }
  0x38   :  { %329 = vmatprep.subr.bf16.mxu0 %v486_v0  ;;  %333 = vmatprep.mubr.msk.bf16.mxu0 %vm487_vm0, %v486_v0  ;;  %v60_v3 = vld [vmem:[#allocation2] sm:$0xff]  ;;  %v61_v4 = vld [vmem:[#allocation2 + $0x8] sm:$0xff]  ;;  %vm100_vm1 = vcmask 261120   ;;  %v371_v8 = vld [vmem:[#allocation7 + $0x10] sm:$0xff]  }
  0x39   :  { %337 = vmatprep.subr.bf16.mxu1 %v486_v0  ;;  %353 = vmatprep.mubr.msk.bf16.mxu1 %vm487_vm0, %v486_v0  ;;  %v369_v5 = vld [vmem:[#allocation7] sm:$0xff]   ;;  %v370_v6 = vld [vmem:[#allocation7 + $0x8] sm:$0xff]   ;;  %v62_v7 = vpack.c.bf16 %v61_v4, %v60_v3  ;;  %v372_v9 = vld [vmem:[#allocation7 + $0x18] sm:$0xff]   ;;  %v85_v15 = vshrl.u32 %v84_v14, 7 }
  0x3a   :  { %330 = vmatpush3.bf16.msra.mxu0 %v367_v1  ;;  %338 = vmatpush3.bf16.msra.mxu1 %v369_v5  ;;  %v373_v10 = vld [vmem:[#allocation7 + $0x20] sm:$0xff]   ;;  %v374_v11 = vld [vmem:[#allocation7 + $0x28] sm:$0xff]   ;;  %v375_v12 = vld [vmem:[#allocation7 + $0x30] sm:$0xff]  }
  0x3b   :  { %331 = vmatprep.subr.bf16.mxu0 %v486_v0  ;;  %339 = vmatprep.subr.bf16.mxu1 %v486_v0  ;;  %v376_v13 = vld [vmem:[#allocation7 + $0x38] sm:$0xff]   ;;  %v86_v16 = vsub.s32 0, %v85_v15  ;;  %v83_v17 = vld [vmem:[%s580_s3] sm:$0xf]  ;;  %v158_v36 = vsub.s32 1, %v85_v15  ;;  %v276_v60 = vsub.s32 2, %v85_v15 }
  0x3c   :  { %v282_v61 = vsub.s32 3, %v85_v15  ;;  %s488_s3 = smov [#allocation8]  }
  0x3d   :  { %v87_v18 = vrot.slane %v83_v17, %v86_v16  ;;  %v159_v37 = vrot.slane %v83_v17, %v158_v36  ;;  %v277_v62 = vrot.slane %v83_v17, %v276_v60  ;;  %s293_s26 = sshll.u32 %s488_s3, 4  ;;  %s294_s26 = int_to_ptr.vmem [resolvable:$true] %s293_s26 }
  0x3e   :  { %332 = vmatpush3.bf16.msra.mxu0 %v368_v2  ;;  %340 = vmatpush3.bf16.msra.mxu1 %v370_v6  ;;  %v283_v1 = vrot.slane %v83_v17, %v282_v61  ;;  %s451_s29 = scalar_lea.vmem %s294_s26, 256  ;;  %p456_p11 = scmp.lt.s32.totalorder %s294_s26, %s294_s26 }
  0x3f   :  { %341 = vmatprep.subr.bf16.mxu1 %v486_v0  ;;  %p452_p10 = scmp.ne.s32.totalorder %s294_s26, %s451_s29  ;;  %p457_p12 = scmp.lt.s32.totalorder %s451_s29, %s451_s29 }
  0x41   :  { %334 = vmatmul.mubr.msk.bf16.vlgmr.msra.gmra.mrb[0].mxu0 %vm100_vm1, %v62_v7  ;;  %p458_p13 = por %p457_p12, %p456_p11 }
  0x42   :  { %342 = vmatpush3.bf16.msra.mxu1 %v371_v8 }
  0x43   :  { %343 = vmatprep.subr.bf16.mxu1 %v486_v0  ;;  %p459_p0 = pnand %p458_p13, %p452_p10 }
  0x46   :  { %344 = vmatpush3.bf16.msra.mxu1 %v372_v9 }
  0x47   :  { %345 = vmatprep.subr.bf16.mxu1 %v486_v0 }
  0x4a   :  { %346 = vmatpush3.bf16.msra.mxu1 %v373_v10 }
  0x4b   :  { %347 = vmatprep.subr.bf16.mxu1 %v486_v0 }
  0x4e   :  { %348 = vmatpush3.bf16.msra.mxu1 %v374_v11 }
  0x4f   :  { %349 = vmatprep.subr.bf16.mxu1 %v486_v0 }
  0x52   :  { %350 = vmatpush3.bf16.msra.mxu1 %v375_v12 }
  0x53   :  { %351 = vmatprep.subr.bf16.mxu1 %v486_v0 }
  0x56   :  { %352 = vmatpush3.bf16.msra.mxu1 %v376_v13 }
 0x114   :  { %v138_v19 = vpop.f32.mrb[0].mxu0 }
 0x115   :  { %v139_v20 = vadd.f32 %v138_v19, %v87_v18  ;;  %v335_v21 = vpop.f32.mrb[1].mxu0 }
 0x116   :  { %v141_v22 = vpop.f32.mrb[2].mxu0 }
 0x117   :  { %v147_v23 = vmul.f32 0.70710677, %v139_v20  ;;  %v142_v24 = vadd.f32 %v141_v22, %v87_v18  ;;  %v336_v25 = vpop.f32.mrb[3].mxu0  ;;  %v145_v30 = vmul.f32 0.5, %v139_v20 }
 0x119   :  { %377 = verf.f32 %v147_v23  ;;  %v148_v26 = vmul.f32 0.70710677, %v142_v24  ;;  %v146_v31 = vmul.f32 0.5, %v142_v24 }
 0x11b   :  { %379 = verf.f32 %v148_v26 }
 0x123   :  { %v378_v27 = vpop.eup %377 }
 0x124   :  { %v151_v28 = vadd.f32 1.0, %v378_v27 }
 0x125   :  { %v380_v29 = vpop.eup %379 }
 0x126   :  { %v152_v32 = vadd.f32 1.0, %v380_v29  ;;  %v153_v33 = vmul.f32 %v151_v28, %v145_v30 }
 0x128   :  { %v154_v34 = vmul.f32 %v152_v32, %v146_v31 }
 0x12a   :  { %v155_v35 = vpack.c.bf16 %v154_v34, %v153_v33 }
 0x12c   :  { %354 = vmatmul.mubr.bf16.vlgmr.msra.gmra.mrb[0].mxu1 %v155_v35 }
 0x1ff   :  { %v242_v38 = vpop.f32.mrb[0].mxu1 }
 0x200   :  { %v243_v39 = vadd.f32 %v242_v38, %v159_v37  ;;  %v355_v40 = vpop.f32.mrb[1].mxu1 }
 0x201   :  { %v245_v41 = vpop.f32.mrb[2].mxu1 }
 0x202   :  { %v246_v42 = vadd.f32 %v245_v41, %v159_v37  ;;  %v356_v43 = vpop.f32.mrb[3].mxu1  ;;  %v249_v44 = vadd.f32 %v243_v39, %v139_v20 }
 0x204   :  { %251 = vadd.xlane.f32.xlu0 %v249_v44  ;;  %v250_v45 = vadd.f32 %v246_v42, %v142_v24 }
 0x208   :  { %253 = vadd.xlane.f32.xlu0 %v250_v45 }
 0x291   :  { %v252_v46 = vpop.xlane.xlu0 %251 }
 0x292   :  { %v256_v47 = vmul.f32 0.0078125, %v252_v46 }
 0x294   :  { %v258_v48 = vsub.f32 %v249_v44, %v256_v47 }
 0x295   :  { %v254_v49 = vpop.xlane.xlu0 %253 }
 0x296   :  { %v257_v50 = vmul.f32 0.0078125, %v254_v49  ;;  %v260_v51 = vmul.f32 %v258_v48, %v258_v48 }
 0x298   :  { %v259_v52 = vsub.f32 %v250_v45, %v257_v50  ;;  %262 = vadd.xlane.f32.xlu1 %v260_v51 }
 0x29a   :  { %v261_v53 = vmul.f32 %v259_v52, %v259_v52 }
 0x29c   :  { %264 = vadd.xlane.f32.xlu1 %v261_v53 }
 0x325   :  { %v263_v54 = vpop.xlane.xlu1 %262 }
 0x326   :  { %v266_v55 = vmul.f32 0.0078125, %v263_v54 }
 0x328   :  { %v268_v56 = vadd.f32 1e-05, %v266_v55 }
 0x329   :  { %v265_v57 = vpop.xlane.xlu1 %264 }
 0x32a   :  { %381 = vrsqrt.f32 %v268_v56  ;;  %v267_v58 = vmul.f32 0.0078125, %v265_v57 }
 0x32c   :  { %v269_v59 = vadd.f32 1e-05, %v267_v58 }
 0x32e   :  { %383 = vrsqrt.f32 %v269_v59 }
 0x334   :  { %v382_v63 = vpop.eup %381 }
 0x335   :  { %v272_v0 = vmul.f32 %v382_v63, %v258_v48 }
 0x337   :  { %v278_v2 = vmul.f32 %v277_v62, %v272_v0 }
 0x338   :  { %v384_v3 = vpop.eup %383 }
 0x339   :  { %v273_v4 = vmul.f32 %v384_v3, %v259_v52  ;;  %v284_v5 = vadd.f32 %v283_v1, %v278_v2 }
 0x33b   :  { %v279_v6 = vmul.f32 %v277_v62, %v273_v4  ;;  %286 = vst [vmem:[#allocation8] sm:$0xff] %v284_v5 }
 0x33d   :  { %v285_v7 = vadd.f32 %v283_v1, %v279_v6 }
 0x33f   :  { %287 = vst [vmem:[#allocation8 + $0x8] sm:$0xff] %v285_v7 }
 0x340   :  { %462 = shalt.err (!%p459_p0)
}
 0x341   :  { %s463_s6 = scalar_lea.hbm %s581_s4, 256 }
 0x342   :  { %p464_p1 = scmp.ne.s32.totalorder %s581_s4, %s463_s6  ;;  %p467_p2 = scmp.lt.u32.totalorder %s463_s6, %s581_s4 }
 0x344   :  { %p469_p3 = pnand %p467_p2, %p464_p1 }
 0x346   :  { %472 = shalt.err (!%p469_p3)
}
 0x347   :  { %299 = dma.vmem_to_hbm [thread:$0]  %s294_s26, 256, %s581_s4, [#allocation4], %s483_s1, %s483_s1, %s484_s13  }
 0x348   :  { %477 = dma.done.wait [#allocation4], 256  }
 0x349   :  { %478 = vsyncadd [#allocation4], 4294967040 }
 0x34a   :  { %303 = vsyncpa [#allocation3], 1 }
 0x34b   :  { %304 = vsyncpa [#allocation6], 1 }
 0x34c   :  { %305 = vsyncpa [#allocation4], 1 }

</bundles_post_ra>
